<compile_context>
chip_gen: v7x
topology: tpu7x:2x2x1
jax: 0.10.0
libtpu: 0.0.40
codegen_flags: <defaults>
</compile_context>

<pallas_src>
import functools

import jax
import jax.numpy as jnp
from jax.experimental import pallas as pl
from jax.experimental.pallas import tpu as pltpu

BN_EPS = 1e-5


def _round_up(x, m):
    return ((x + m - 1) // m) * m


def _fused_kernel(xt_ref, w1t_ref, gamma_ref, beta_ref, w2t_ref, b2_ref, ot_ref,
                  sum_ref, sumsq_ref, scale_ref, shift_ref, *, inv_n):
    """grid = (2, n_tiles); phase 0 accumulates BN stats, phase 1 applies BN + ReLU + fc2.

    Transposed (feature-major) blocks so the lane axis is the row-tile axis (multiple of 128):
      xt_ref:     (D, tn)  f32   tile of x^T
      w1t_ref:    (H, D)   bf16  fc1 weight transposed (resident)
      gamma/beta: (H, 1)   f32
      w2t_ref:    (D, H)   bf16  fc2 weight transposed (resident)
      b2_ref:     (D, 1)   f32
      ot_ref:     (D, tn)        tile of out^T
    """
    phase = pl.program_id(0)
    tile = pl.program_id(1)

    # fc1 on this row tile (recomputed in both phases; cheaper than round-tripping the
    # (H, N) hidden tensor through HBM).  bf16 MXU operands, f32 accumulation.
    xt = xt_ref[...].astype(jnp.bfloat16)
    ht = jnp.dot(w1t_ref[...], xt, preferred_element_type=jnp.float32)       # (H, tn) f32

    @pl.when(phase == 0)
    def _accumulate_stats():
        @pl.when(tile == 0)
        def _init():
            sum_ref[...] = jnp.zeros_like(sum_ref)
            sumsq_ref[...] = jnp.zeros_like(sumsq_ref)
        # Zero-padded rows (columns of x^T) contribute exactly 0 here (fc1 bias dropped),
        # so dividing by the true N keeps the batch statistics exact.
        sum_ref[...] += jnp.sum(ht, axis=1, keepdims=True)                   # (H, 1)
        sumsq_ref[...] += jnp.sum(ht * ht, axis=1, keepdims=True)            # (H, 1)

    @pl.when(phase == 1)
    def _normalize_and_project():
        @pl.when(tile == 0)
        def _fold_bn_affine():
            mean = sum_ref[...] * inv_n                                      # (H, 1)
            # One-pass variance E[h^2] - mean^2 in f32; the clamp guards tiny negative
            # cancellation.  Safe at these N / bf16-rounded activations; for huge N with
            # |mean| >> std, switch to per-tile centered sums.
            var = jnp.maximum(sumsq_ref[...] * inv_n - mean * mean, 0.0)
            sc = gamma_ref[...] * jax.lax.rsqrt(var + BN_EPS)                # EUP slot
            scale_ref[...] = sc
            shift_ref[...] = beta_ref[...] - mean * sc
        a = jnp.maximum(ht * scale_ref[...] + shift_ref[...], 0.0)           # BN + ReLU, f32
        out = jnp.dot(w2t_ref[...], a.astype(jnp.bfloat16),
                      preferred_element_type=jnp.float32) + b2_ref[...]      # (D, tn) f32
        ot_ref[...] = out.astype(ot_ref.dtype)


def mlp_prediction(x, w1, b1, gamma, beta, w2, b2, *, tile_n=4096,
                   vmem_limit_bytes=32 * 1024 * 1024):
    """x: (B, T, final_dim) f32.  w1: (D, H), w2: (H, D), b1/gamma/beta: (1, H), b2: (1, D).

    Matches the PyTorch module's training-mode forward (BatchNorm1d over the B*T rows).
    """
    # fc1 bias is exactly absorbed by the training-mode BatchNorm that follows (batch mean
    # soaks it up, variance unchanged).  Must be reinstated if eval-mode running stats are used.
    del b1

    B, T, D = x.shape
    H = w1.shape[1]
    N = B * T

    # Row tile = lane axis of the transposed blocks; a multiple of 128 keeps every load/store
    # lane-dense, and a large tile amortizes the per-grid-step overhead.
    tn = _round_up(min(tile_n, _round_up(N, 128)), 128)
    n_pad = _round_up(N, tn)
    n_tiles = n_pad // tn

    xt = x.reshape(N, D).T                                   # (D, N) — layout plumbing only
    if n_pad != N:
        xt = jnp.pad(xt, ((0, 0), (0, n_pad - N)))           # zero rows -> zero stats contribution

    w1t = w1.T.astype(jnp.bfloat16)                          # (H, D)
    w2t = w2.T.astype(jnp.bfloat16)                          # (D, H)
    gamma_c = gamma.reshape(H, 1).astype(jnp.float32)
    beta_c = beta.reshape(H, 1).astype(jnp.float32)
    b2_c = b2.reshape(D, 1).astype(jnp.float32)

    kernel = functools.partial(_fused_kernel, inv_n=1.0 / N)

    # Output index map p*i pins the output block at 0 during the stats phase (no garbage block
    # is ever flushed); each block is then written exactly once, consecutively, in phase 1.
    out_t = pl.pallas_call(
        kernel,
        out_shape=jax.ShapeDtypeStruct((D, n_pad), x.dtype),
        grid=(2, n_tiles),
        in_specs=[
            pl.BlockSpec((D, tn), lambda p, i: (0, i)),      # x^T row tile (phase-agnostic)
            pl.BlockSpec((H, D), lambda p, i: (0, 0)),       # resident weights / vectors
            pl.BlockSpec((H, 1), lambda p, i: (0, 0)),
            pl.BlockSpec((H, 1), lambda p, i: (0, 0)),
            pl.BlockSpec((D, H), lambda p, i: (0, 0)),
            pl.BlockSpec((D, 1), lambda p, i: (0, 0)),
        ],
        out_specs=pl.BlockSpec((D, tn), lambda p, i: (0, p * i)),
        scratch_shapes=[
            pltpu.VMEM((H, 1), jnp.float32),                 # sum(h)   per channel
            pltpu.VMEM((H, 1), jnp.float32),                 # sum(h^2) per channel
            pltpu.VMEM((H, 1), jnp.float32),                 # folded BN scale
            pltpu.VMEM((H, 1), jnp.float32),                 # folded BN shift
        ],
        compiler_params=pltpu.CompilerParams(
            # Phase 1 depends on stats accumulated across ALL phase-0 tiles, so the grid is
            # sequential.  For very large N on v7x, split into two parallel pallas_calls to
            # shard row tiles across both TensorCores.
            dimension_semantics=("arbitrary", "arbitrary"),
            vmem_limit_bytes=vmem_limit_bytes),
    )(xt, w1t, gamma_c, beta_c, w2t, b2_c)

    return out_t[:, :N].T.reshape(B, T, D)


def _reference(x, w1, b1, gamma, beta, w2, b2):
    # Plain-JAX f32 reference mirroring the PyTorch forward (training-mode BN, with fc1 bias).
    B, T, D = x.shape
    h = x.reshape(B * T, D) @ w1 + b1
    mean = h.mean(axis=0, keepdims=True)
    var = ((h - mean) ** 2).mean(axis=0, keepdims=True)
    h = (h - mean) / jnp.sqrt(var + BN_EPS)
    h = h * gamma + beta
    h = jnp.maximum(h, 0.0)
    out = h @ w2 + b2
    return out.reshape(B, T, D)


if __name__ == "__main__":
    def run_case(B, T, final_dim, hidden_dim, tile_n, nontrivial_bn):
        key = jax.random.PRNGKey(0)
        kx, kw1, kb1, kw2, kb2, kg, kbn = jax.random.split(key, 7)

        x = jax.random.normal(kx, (B, T, final_dim), dtype=jnp.float32)

        lim1 = 1.0 / (final_dim ** 0.5)
        w1 = jax.random.uniform(kw1, (final_dim, hidden_dim), jnp.float32, -lim1, lim1)
        b1 = jax.random.uniform(kb1, (1, hidden_dim), jnp.float32, -lim1, lim1)
        lim2 = 1.0 / (hidden_dim ** 0.5)
        w2 = jax.random.uniform(kw2, (hidden_dim, final_dim), jnp.float32, -lim2, lim2)
        b2 = jax.random.uniform(kb2, (1, final_dim), jnp.float32, -lim2, lim2)

        if nontrivial_bn:
            gamma = 1.0 + 0.1 * jax.random.normal(kg, (1, hidden_dim), jnp.float32)
            beta = 0.1 * jax.random.normal(kbn, (1, hidden_dim), jnp.float32)
        else:  # BatchNorm1d default init
            gamma = jnp.ones((1, hidden_dim), jnp.float32)
            beta = jnp.zeros((1, hidden_dim), jnp.float32)

        out = mlp_prediction(x, w1, b1, gamma, beta, w2, b2, tile_n=tile_n)
        out = jax.block_until_ready(out)
        ref = _reference(x, w1, b1, gamma, beta, w2, b2)

        assert out.shape == (B, T, final_dim)
        # Tolerances sized for bf16 MXU operands (f32 accumulation / f32 statistics).
        max_err = float(jnp.max(jnp.abs(out - ref)))
        mean_err = float(jnp.mean(jnp.abs(out - ref)))
        assert jnp.allclose(out, ref, atol=5e-2, rtol=5e-2), max_err
        assert mean_err < 1e-2, mean_err

    # Small shapes implied by the module's forward: N=16 -> one 128-row tile, grid=(2, 1).
    run_case(B=2, T=8, final_dim=32, hidden_dim=64, tile_n=4096, nontrivial_bn=False)
    # Multi-tile path with row padding: N=300 -> 3 tiles of 128 (84 zero-padded rows).
    run_case(B=3, T=100, final_dim=32, hidden_dim=64, tile_n=128, nontrivial_bn=True)

    print("KERNEL_OK")
</pallas_src>

<mosaic_0001>
module attributes {stable_mosaic.version = 11 : i64} {
  func.func @_fused_kernel(%arg0: i32, %arg1: i32, %arg2: memref<32x128xf32, #tpu.memory_space<vmem>>, %arg3: memref<64x32xbf16, #tpu.memory_space<vmem>>, %arg4: memref<64x1xf32, #tpu.memory_space<vmem>>, %arg5: memref<64x1xf32, #tpu.memory_space<vmem>>, %arg6: memref<32x64xbf16, #tpu.memory_space<vmem>>, %arg7: memref<32x1xf32, #tpu.memory_space<vmem>>, %arg8: memref<32x128xf32, #tpu.memory_space<vmem>>, %arg9: memref<64x1xf32, #tpu.memory_space<vmem>>, %arg10: memref<64x1xf32, #tpu.memory_space<vmem>>, %arg11: memref<64x1xf32, #tpu.memory_space<vmem>>, %arg12: memref<64x1xf32, #tpu.memory_space<vmem>>) attributes {dimension_semantics = [#tpu.dimension_semantics<arbitrary>, #tpu.dimension_semantics<arbitrary>], iteration_bounds = array<i64: 2, 1>, scalar_prefetch = 0 : i64, scratch_operands = 4 : i64, tpu.core_type = #tpu.core_type<tc>, window_params = [{transform_indices = @transform_0, window_bounds = array<i64: 32, 128>}, {pipeline_mode = #tpu.pipeline_mode<synchronous>, transform_indices = @transform_1, window_bounds = array<i64: 64, 32>}, {pipeline_mode = #tpu.pipeline_mode<synchronous>, transform_indices = @transform_2, window_bounds = array<i64: 64, 1>}, {pipeline_mode = #tpu.pipeline_mode<synchronous>, transform_indices = @transform_3, window_bounds = array<i64: 64, 1>}, {pipeline_mode = #tpu.pipeline_mode<synchronous>, transform_indices = @transform_4, window_bounds = array<i64: 32, 64>}, {pipeline_mode = #tpu.pipeline_mode<synchronous>, transform_indices = @transform_5, window_bounds = array<i64: 32, 1>}, {transform_indices = @transform_6, window_bounds = array<i64: 32, 128>}]} {
    %c0 = arith.constant 0 : index
    %c0_0 = arith.constant 0 : index
    %0 = vector.load %arg2[%c0, %c0_0] : memref<32x128xf32, #tpu.memory_space<vmem>>, vector<32x128xf32>
    %1 = arith.truncf %0 : vector<32x128xf32> to vector<32x128xbf16>
    %c0_1 = arith.constant 0 : index
    %c0_2 = arith.constant 0 : index
    %2 = vector.load %arg3[%c0_1, %c0_2] : memref<64x32xbf16, #tpu.memory_space<vmem>>, vector<64x32xbf16>
    %cst = arith.constant dense<0.000000e+00> : vector<64x128xf32>
    %3 = tpu.matmul %2, %1, %cst {dimension_numbers = #tpu.dot_dimension_numbers<[1], [0], [0], [1], [0, 0, 1, 1], [], []>} : vector<64x32xbf16>, vector<32x128xbf16>, vector<64x128xf32> -> vector<64x128xf32>
    %c0_i32 = arith.constant 0 : i32
    %4 = arith.cmpi eq, %arg0, %c0_i32 : i32
    %5 = arith.extui %4 : i1 to i32
    %c0_i32_3 = arith.constant 0 : i32
    %6 = arith.cmpi ne, %5, %c0_i32_3 : i32
    scf.if %6 {
      %c0_i32_5 = arith.constant 0 : i32
      %10 = arith.cmpi eq, %arg1, %c0_i32_5 : i32
      %11 = arith.extui %10 : i1 to i32
      %c0_i32_6 = arith.constant 0 : i32
      %12 = arith.cmpi ne, %11, %c0_i32_6 : i32
      scf.if %12 {
        %cst_17 = arith.constant 0.000000e+00 : f32
        %24 = vector.broadcast %cst_17 : f32 to vector<64x1xf32>
        %c0_18 = arith.constant 0 : index
        %c0_19 = arith.constant 0 : index
        %25 = vector.load %arg9[%c0_18, %c0_19] : memref<64x1xf32, #tpu.memory_space<vmem>>, vector<64x1xf32>
        tpu.vector_store %arg9[%c0_18, %c0_19], %24 {strides = array<i32>} : memref<64x1xf32, #tpu.memory_space<vmem>>, vector<64x1xf32>,
        %cst_20 = arith.constant 0.000000e+00 : f32
        %26 = vector.broadcast %cst_20 : f32 to vector<64x1xf32>
        %c0_21 = arith.constant 0 : index
        %c0_22 = arith.constant 0 : index
        %27 = vector.load %arg10[%c0_21, %c0_22] : memref<64x1xf32, #tpu.memory_space<vmem>>, vector<64x1xf32>
        tpu.vector_store %arg10[%c0_21, %c0_22], %26 {strides = array<i32>} : memref<64x1xf32, #tpu.memory_space<vmem>>, vector<64x1xf32>,
      } else {
      }
      %c0_7 = arith.constant 0 : index
      %c0_8 = arith.constant 0 : index
      %13 = vector.load %arg9[%c0_7, %c0_8] : memref<64x1xf32, #tpu.memory_space<vmem>>, vector<64x1xf32>
      %cst_9 = arith.constant dense<0.000000e+00> : vector<64xf32>
      %14 = vector.multi_reduction <add>, %3, %cst_9 [1] : vector<64x128xf32> to vector<64xf32>
      %15 = vector.shape_cast %14 : vector<64xf32> to vector<64x1xf32>
      %16 = arith.addf %13, %15 : vector<64x1xf32>
      %c0_10 = arith.constant 0 : index
      %c0_11 = arith.constant 0 : index
      %17 = vector.load %arg9[%c0_10, %c0_11] : memref<64x1xf32, #tpu.memory_space<vmem>>, vector<64x1xf32>
      tpu.vector_store %arg9[%c0_10, %c0_11], %16 {strides = array<i32>} : memref<64x1xf32, #tpu.memory_space<vmem>>, vector<64x1xf32>,
      %c0_12 = arith.constant 0 : index
      %c0_13 = arith.constant 0 : index
      %18 = vector.load %arg10[%c0_12, %c0_13] : memref<64x1xf32, #tpu.memory_space<vmem>>, vector<64x1xf32>
      %19 = arith.mulf %3, %3 : vector<64x128xf32>
      %cst_14 = arith.constant dense<0.000000e+00> : vector<64xf32>
      %20 = vector.multi_reduction <add>, %19, %cst_14 [1] : vector<64x128xf32> to vector<64xf32>
      %21 = vector.shape_cast %20 : vector<64xf32> to vector<64x1xf32>
      %22 = arith.addf %18, %21 : vector<64x1xf32>
      %c0_15 = arith.constant 0 : index
      %c0_16 = arith.constant 0 : index
      %23 = vector.load %arg10[%c0_15, %c0_16] : memref<64x1xf32, #tpu.memory_space<vmem>>, vector<64x1xf32>
      tpu.vector_store %arg10[%c0_15, %c0_16], %22 {strides = array<i32>} : memref<64x1xf32, #tpu.memory_space<vmem>>, vector<64x1xf32>,
    } else {
    }
    %c1_i32 = arith.constant 1 : i32
    %7 = arith.cmpi eq, %arg0, %c1_i32 : i32
    %8 = arith.extui %7 : i1 to i32
    %c0_i32_4 = arith.constant 0 : i32
    %9 = arith.cmpi ne, %8, %c0_i32_4 : i32
    scf.if %9 {
      %c0_i32_5 = arith.constant 0 : i32
      %10 = arith.cmpi eq, %arg1, %c0_i32_5 : i32
      %11 = arith.extui %10 : i1 to i32
      %c0_i32_6 = arith.constant 0 : i32
      %12 = arith.cmpi ne, %11, %c0_i32_6 : i32
      scf.if %12 {
        %c0_19 = arith.constant 0 : index
        %c0_20 = arith.constant 0 : index
        %28 = vector.load %arg9[%c0_19, %c0_20] : memref<64x1xf32, #tpu.memory_space<vmem>>, vector<64x1xf32>
        %cst_21 = arith.constant 6.250000e-02 : f32
        %29 = vector.broadcast %cst_21 : f32 to vector<64x1xf32>
        %30 = arith.mulf %28, %29 : vector<64x1xf32>
        %c0_22 = arith.constant 0 : index
        %c0_23 = arith.constant 0 : index
        %31 = vector.load %arg10[%c0_22, %c0_23] : memref<64x1xf32, #tpu.memory_space<vmem>>, vector<64x1xf32>
        %cst_24 = arith.constant 6.250000e-02 : f32
        %32 = vector.broadcast %cst_24 : f32 to vector<64x1xf32>
        %33 = arith.mulf %31, %32 : vector<64x1xf32>
        %34 = arith.mulf %30, %30 : vector<64x1xf32>
        %35 = arith.subf %33, %34 : vector<64x1xf32>
        %cst_25 = arith.constant 0.000000e+00 : f32
        %36 = vector.broadcast %cst_25 : f32 to vector<64x1xf32>
        %37 = arith.maximumf %35, %36 : vector<64x1xf32>
        %c0_26 = arith.constant 0 : index
        %c0_27 = arith.constant 0 : index
        %38 = vector.load %arg4[%c0_26, %c0_27] : memref<64x1xf32, #tpu.memory_space<vmem>>, vector<64x1xf32>
        %cst_28 = arith.constant 9.99999974E-6 : f32
        %39 = vector.broadcast %cst_28 : f32 to vector<64x1xf32>
        %40 = arith.addf %37, %39 : vector<64x1xf32>
        %41 = math.rsqrt %40 : vector<64x1xf32>
        %42 = arith.mulf %38, %41 : vector<64x1xf32>
        %c0_29 = arith.constant 0 : index
        %c0_30 = arith.constant 0 : index
        %43 = vector.load %arg11[%c0_29, %c0_30] : memref<64x1xf32, #tpu.memory_space<vmem>>, vector<64x1xf32>
        tpu.vector_store %arg11[%c0_29, %c0_30], %42 {strides = array<i32>} : memref<64x1xf32, #tpu.memory_space<vmem>>, vector<64x1xf32>,
        %c0_31 = arith.constant 0 : index
        %c0_32 = arith.constant 0 : index
        %44 = vector.load %arg5[%c0_31, %c0_32] : memref<64x1xf32, #tpu.memory_space<vmem>>, vector<64x1xf32>
        %45 = arith.mulf %30, %42 : vector<64x1xf32>
        %46 = arith.subf %44, %45 : vector<64x1xf32>
        %c0_33 = arith.constant 0 : index
        %c0_34 = arith.constant 0 : index
        %47 = vector.load %arg12[%c0_33, %c0_34] : memref<64x1xf32, #tpu.memory_space<vmem>>, vector<64x1xf32>
        tpu.vector_store %arg12[%c0_33, %c0_34], %46 {strides = array<i32>} : memref<64x1xf32, #tpu.memory_space<vmem>>, vector<64x1xf32>,
      } else {
      }
      %c0_7 = arith.constant 0 : index
      %c0_8 = arith.constant 0 : index
      %13 = vector.load %arg11[%c0_7, %c0_8] : memref<64x1xf32, #tpu.memory_space<vmem>>, vector<64x1xf32>
      %14 = vector.broadcast %13 : vector<64x1xf32> to vector<64x128xf32>
      %15 = arith.mulf %3, %14 : vector<64x128xf32>
      %c0_9 = arith.constant 0 : index
      %c0_10 = arith.constant 0 : index
      %16 = vector.load %arg12[%c0_9, %c0_10] : memref<64x1xf32, #tpu.memory_space<vmem>>, vector<64x1xf32>
      %17 = vector.broadcast %16 : vector<64x1xf32> to vector<64x128xf32>
      %18 = arith.addf %15, %17 : vector<64x128xf32>
      %cst_11 = arith.constant 0.000000e+00 : f32
      %19 = vector.broadcast %cst_11 : f32 to vector<64x128xf32>
      %20 = arith.maximumf %18, %19 : vector<64x128xf32>
      %c0_12 = arith.constant 0 : index
      %c0_13 = arith.constant 0 : index
      %21 = vector.load %arg6[%c0_12, %c0_13] : memref<32x64xbf16, #tpu.memory_space<vmem>>, vector<32x64xbf16>
      %22 = arith.truncf %20 : vector<64x128xf32> to vector<64x128xbf16>
      %cst_14 = arith.constant dense<0.000000e+00> : vector<32x128xf32>
      %23 = tpu.matmul %21, %22, %cst_14 {dimension_numbers = #tpu.dot_dimension_numbers<[1], [0], [0], [1], [0, 0, 1, 1], [], []>} : vector<32x64xbf16>, vector<64x128xbf16>, vector<32x128xf32> -> vector<32x128xf32>
      %c0_15 = arith.constant 0 : index
      %c0_16 = arith.constant 0 : index
      %24 = vector.load %arg7[%c0_15, %c0_16] : memref<32x1xf32, #tpu.memory_space<vmem>>, vector<32x1xf32>
      %25 = vector.broadcast %24 : vector<32x1xf32> to vector<32x128xf32>
      %26 = arith.addf %23, %25 : vector<32x128xf32>
      %c0_17 = arith.constant 0 : index
      %c0_18 = arith.constant 0 : index
      %27 = vector.load %arg8[%c0_17, %c0_18] : memref<32x128xf32, #tpu.memory_space<vmem>>, vector<32x128xf32>
      tpu.vector_store %arg8[%c0_17, %c0_18], %26 {strides = array<i32>} : memref<32x128xf32, #tpu.memory_space<vmem>>, vector<32x128xf32>,
    } else {
    }
    return
  }
  func.func @transform_0(%arg0: i32, %arg1: i32) -> (i32, i32) {
    %c0_i32 = arith.constant 0 : i32
    %c0_i32_0 = arith.constant 0 : i32
    return %c0_i32, %arg1 : i32, i32
  }
  func.func @transform_1(%arg0: i32, %arg1: i32) -> (i32, i32) {
    %c0_i32 = arith.constant 0 : i32
    %c0_i32_0 = arith.constant 0 : i32
    %c0_i32_1 = arith.constant 0 : i32
    return %c0_i32, %c0_i32_0 : i32, i32
  }
  func.func @transform_2(%arg0: i32, %arg1: i32) -> (i32, i32) {
    %c0_i32 = arith.constant 0 : i32
    %c0_i32_0 = arith.constant 0 : i32
    %c0_i32_1 = arith.constant 0 : i32
    return %c0_i32, %c0_i32_0 : i32, i32
  }
  func.func @transform_3(%arg0: i32, %arg1: i32) -> (i32, i32) {
    %c0_i32 = arith.constant 0 : i32
    %c0_i32_0 = arith.constant 0 : i32
    %c0_i32_1 = arith.constant 0 : i32
    return %c0_i32, %c0_i32_0 : i32, i32
  }
  func.func @transform_4(%arg0: i32, %arg1: i32) -> (i32, i32) {
    %c0_i32 = arith.constant 0 : i32
    %c0_i32_0 = arith.constant 0 : i32
    %c0_i32_1 = arith.constant 0 : i32
    return %c0_i32, %c0_i32_0 : i32, i32
  }
  func.func @transform_5(%arg0: i32, %arg1: i32) -> (i32, i32) {
    %c0_i32 = arith.constant 0 : i32
    %c0_i32_0 = arith.constant 0 : i32
    %c0_i32_1 = arith.constant 0 : i32
    return %c0_i32, %c0_i32_0 : i32, i32
  }
  func.func @transform_6(%arg0: i32, %arg1: i32) -> (i32, i32) {
    %0 = arith.muli %arg0, %arg1 : i32
    %c0_i32 = arith.constant 0 : i32
    %c0_i32_0 = arith.constant 0 : i32
    return %c0_i32, %0 : i32, i32
  }
}

</mosaic_0001>

<bundles_post_ra>
// kernel: tpu_custom_call.1
= control target key start
LH: loop header
LB: loop body
LE: loop exit
PB: predicated region body
PF: predicated region fallthrough
CT: control target
= control target key end

     0   :  { %11 = vsyncpa [#allocation7], 0  ;;  %s1444_s0 = inlined_call_operand.vmem [shape: f32[32,128], index: 0, kind: input, shape index: {}]   ;;  %s1445_s1 = inlined_call_operand.vmem [shape: bf16[64,32], index: 1, kind: input, shape index: {}]   ;;  %s1446_s2 = inlined_call_operand.vmem [shape: f32[64,1], index: 2, kind: input, shape index: {}]   ;;  %s1447_s3 = inlined_call_operand.vmem [shape: f32[64,1], index: 3, kind: input, shape index: {}]   ;;  %s1448_s4 = inlined_call_operand.vmem [shape: bf16[32,64], index: 4, kind: input, shape index: {}]   ;;  %s1449_s5 = inlined_call_operand.vmem [shape: f32[32,1], index: 5, kind: input, shape index: {}]   ;;  %s1450_s6 = inlined_call_operand.hbm [shape: f32[32,128], index: 6, kind: output, shape index: {}]  }
   0x1   :  { %13 = vsyncpa [#allocation7 + $0x1], 0  ;;  %s1156_s21 = smov 0   ;;  %s1158_s22 = smov 0  }
   0x2   :  { %s1160_s23 = smov 0  }
   0x3 LB: > { %s935_s24 = sadd.s32 4294967295, %s1114_s23   ;;  %s936_s25 = sadd.s32 4294967294, %s1114_s23   ;;  %s1114_s23 = sphi %s1160_s23, %s19_s23   ;;  %s1110_s22 = sphi %s1158_s22, %s1453_s22   ;;  %s1106_s21 = sphi %s1156_s21, %s1452_s21  }
   0x4   : > { %s31_s26 = sadd.s32 1, %s1110_s22  ;;  %p939_p0 = scmp.ge.s32.totalorder %s1114_s23, 1 }
   0x5   : > { %p33_p1 = scmp.ge.s32.totalorder %s31_s26, 2  ;;  %p228_p2 = scmp.lt.s32.totalorder %s1114_s23, 3 }
   0x7   : > { %s1455_s26 = smov (%p33_p1, %s31_s26), 0  ;;  %p229_p3 = pnand %p939_p0, %p228_p2 }
   0x8   : > { %v263_v0 = vld [vmem:[%s1444_s0] sm:$0xff] (!%p229_p3)  ;;  %v264_v1 = vld [vmem:[%s1444_s0 + $0x8] sm:$0xff] (!%p229_p3)  ;;  %v265_v2 = vld [vmem:[%s1444_s0 + $0x10] sm:$0xff] (!%p229_p3)  ;;  %vm297_vm0 = vcmask (!%p229_p3), 261120   ;;  %p948_p4 = scmp.ne.s32.totalorder (!%p229_p3), %s1106_s21, 0 }
   0x9   : > { %232 = sbr.rel (%p229_p3) target bundleno = 847 (0x34f), region = 44  ;;  %v267_v3 = vpack.c.bf16 (!%p229_p3), %v264_v1, %v263_v0  ;;  %v266_v4 = vld [vmem:[%s1444_s0 + $0x18] sm:$0xff] (!%p229_p3)  ;;  %v1038_v6 = vld [vmem:[%s1445_s1] sm:$0xff] (!%p229_p3)   ;;  %v1039_v7 = vld [vmem:[%s1445_s1 + $0x10] sm:$0xff] (!%p229_p3)  }
   0xa   : > { %v268_v5 = vpack.c.bf16 (!%p229_p3), %v266_v4, %v265_v2  ;;  %974 = vmatprep.mubr.msk.bf16.mxu0 (!%p229_p3), %vm297_vm0, %v1038_v6  ;;  %978 = vmatprep.mubr.msk.bf16.mxu1 (!%p229_p3), %vm297_vm0, %v1039_v7  ;;  %v1040_v8 = vld [vmem:[%s1445_s1 + $0x8] sm:$0xff] (!%p229_p3)   ;;  %v1041_v9 = vld [vmem:[%s1445_s1 + $0x18] sm:$0xff] (!%p229_p3)  }
   0xb   : > { %970 = vmatprep.subr.bf16.mxu0 (!%p229_p3), %v267_v3  ;;  %994 = vmatprep.subr.bf16.mxu1 (!%p229_p3), %v267_v3 }
   0xc   : > { %971 = vmatpush3.bf16.msra.mxu0 (!%p229_p3), %v267_v3  ;;  %996 = vmatpush3.bf16.msra.mxu1 (!%p229_p3), %v267_v3 }
   0xd   : > { %972 = vmatprep.subr.bf16.mxu0 (!%p229_p3), %v268_v5  ;;  %995 = vmatprep.subr.bf16.mxu1 (!%p229_p3), %v268_v5 }
  0x10   : > { %973 = vmatpush3.bf16.msra.mxu0 %v268_v5  ;;  %997 = vmatpush3.bf16.msra.mxu1 %v268_v5  ;;  %vm383_vm1 = vcmask (!%p948_p4), 7168   ;;  %v1116_v18 = vmov (!%p948_p4), 0.0  }
  0x11   : > { %386 = vst.msk [vmem:[#allocation2 + $0x10] sm:$0xff] (!%p948_p4), %vm383_vm1, %v1116_v18  ;;  %384 = vst.msk [vmem:[#allocation2] sm:$0xff] (!%p948_p4), %vm383_vm1, %v1116_v18 }
  0x12   : > { %385 = vst.msk [vmem:[#allocation2 + $0x8] sm:$0xff] (!%p948_p4), %vm383_vm1, %v1116_v18  ;;  %387 = vst.msk [vmem:[#allocation2 + $0x18] sm:$0xff] (!%p948_p4), %vm383_vm1, %v1116_v18 }
  0x13   : > { %975 = vmatmul.mubr.msk.bf16.vlgmr.msra.gmra.mrb[0].mxu0 %vm297_vm0, %v1040_v8  ;;  %979 = vmatmul.mubr.msk.bf16.vlgmr.msra.gmra.mrb[0].mxu1 %vm297_vm0, %v1041_v9  ;;  %388 = vst.msk [vmem:[#allocation2 + $0x20] sm:$0xff] (!%p948_p4), %vm383_vm1, %v1116_v18  ;;  %389 = vst.msk [vmem:[#allocation2 + $0x28] sm:$0xff] (!%p948_p4), %vm383_vm1, %v1116_v18 }
  0x14   : > { %390 = vst.msk [vmem:[#allocation2 + $0x30] sm:$0xff] (!%p948_p4), %vm383_vm1, %v1116_v18  ;;  %391 = vst.msk [vmem:[#allocation2 + $0x38] sm:$0xff] (!%p948_p4), %vm383_vm1, %v1116_v18 }
  0x15   : > { %392 = vst.msk [vmem:[#allocation3] sm:$0xff] (!%p948_p4), %vm383_vm1, %v1116_v18  ;;  %393 = vst.msk [vmem:[#allocation3 + $0x8] sm:$0xff] (!%p948_p4), %vm383_vm1, %v1116_v18 }
  0x16   : > { %394 = vst.msk [vmem:[#allocation3 + $0x10] sm:$0xff] (!%p948_p4), %vm383_vm1, %v1116_v18  ;;  %395 = vst.msk [vmem:[#allocation3 + $0x18] sm:$0xff] (!%p948_p4), %vm383_vm1, %v1116_v18 }
  0x17   : > { %396 = vst.msk [vmem:[#allocation3 + $0x20] sm:$0xff] (!%p948_p4), %vm383_vm1, %v1116_v18  ;;  %397 = vst.msk [vmem:[#allocation3 + $0x28] sm:$0xff] (!%p948_p4), %vm383_vm1, %v1116_v18 }
  0x18   : > { %398 = vst.msk [vmem:[#allocation3 + $0x30] sm:$0xff] (!%p948_p4), %vm383_vm1, %v1116_v18  ;;  %399 = vst.msk [vmem:[#allocation3 + $0x38] sm:$0xff] (!%p948_p4), %vm383_vm1, %v1116_v18  ;;  %v402_v27 = vld [vmem:[#allocation2 + $0x10] sm:$0xff] (!%p948_p4)  ;;  %v400_v28 = vld [vmem:[#allocation2] sm:$0xff] (!%p948_p4) }
  0x19   : > { %v403_v33 = vld [vmem:[#allocation2 + $0x18] sm:$0xff] (!%p948_p4)  ;;  %v401_v34 = vld [vmem:[#allocation2 + $0x8] sm:$0xff] (!%p948_p4) }
  0x1a   : > { %v405_v39 = vld [vmem:[#allocation2 + $0x28] sm:$0xff] (!%p948_p4)  ;;  %v404_v40 = vld [vmem:[#allocation2 + $0x20] sm:$0xff] (!%p948_p4) }
  0x1b   : > { %v407_v45 = vld [vmem:[#allocation2 + $0x38] sm:$0xff] (!%p948_p4)  ;;  %v406_v46 = vld [vmem:[#allocation2 + $0x30] sm:$0xff] (!%p948_p4) }
  0x1c   : > { %v442_v51 = vld [vmem:[#allocation3 + $0x8] sm:$0xff] (!%p948_p4)  ;;  %v441_v52 = vld [vmem:[#allocation3] sm:$0xff] (!%p948_p4) }
  0x1d   : > { %v444_v57 = vld [vmem:[#allocation3 + $0x18] sm:$0xff] (!%p948_p4)  ;;  %v443_v58 = vld [vmem:[#allocation3 + $0x10] sm:$0xff] (!%p948_p4) }
  0x1e   : > { %v446_v63 = vld [vmem:[#allocation3 + $0x28] sm:$0xff] (!%p948_p4)  ;;  %v445_v0 = vld [vmem:[#allocation3 + $0x20] sm:$0xff] (!%p948_p4) }
  0x1f   : > { %v448_v5 = vld [vmem:[#allocation3 + $0x38] sm:$0xff] (!%p948_p4)  ;;  %v447_v6 = vld [vmem:[#allocation3 + $0x30] sm:$0xff] (!%p948_p4) }
  0xe3   : > { %378 = sbr.rel (%p948_p4) target bundleno = 405 (0x195), region = 48 }
  0xe6   : > { %v1202_v10 = vpop.f32.mrb[0].mxu0  ;;  %v1204_v11 = vpop.f32.mrb[0].mxu1 }
  0xe7   : > { %v1206_v12 = vpop.f32.mrb[1].mxu0  ;;  %v1208_v13 = vpop.f32.mrb[1].mxu1  ;;  %412 = vadd.xlane.f32.xlu1 (!%p948_p4), %v1202_v10  ;;  %v451_v22 = vmul.f32 (!%p948_p4), %v1202_v10, %v1202_v10  ;;  %v455_v26 = vmul.f32 (!%p948_p4), %v1204_v11, %v1204_v11 }
  0xe8   : > { %v1210_v14 = vpop.f32.mrb[2].mxu0  ;;  %v1212_v15 = vpop.f32.mrb[2].mxu1  ;;  %408 = vadd.xlane.f32.xlu0 (!%p948_p4), %v1206_v12  ;;  %v449_v20 = vmul.f32 (!%p948_p4), %v1206_v12, %v1206_v12  ;;  %v453_v24 = vmul.f32 (!%p948_p4), %v1208_v13, %v1208_v13 }
  0xe9   : > { %v1214_v16 = vpop.f32.mrb[3].mxu0  ;;  %v1216_v17 = vpop.f32.mrb[3].mxu1  ;;  %v452_v21 = vmul.f32 (!%p948_p4), %v1210_v14, %v1210_v14  ;;  %v456_v25 = vmul.f32 (!%p948_p4), %v1212_v15, %v1212_v15 }
  0xea   : > { %v450_v19 = vmul.f32 %v1214_v16, %v1214_v16  ;;  %v454_v23 = vmul.f32 %v1216_v17, %v1216_v17 }
  0xeb   : > { %414 = vadd.xlane.f32.xlu1 %v1210_v14 }
  0xec   : > { %410 = vadd.xlane.f32.xlu0 %v1214_v16 }
  0xef   : > { %418 = vadd.xlane.f32.xlu1 %v1216_v17 }
  0xf0   : > { %416 = vadd.xlane.f32.xlu0 %v1208_v13 }
  0xf3   : > { %422 = vadd.xlane.f32.xlu1 %v1212_v15 }
  0xf4   : > { %420 = vadd.xlane.f32.xlu0 %v1204_v11 }
  0xf7   : > { %459 = vadd.xlane.f32.xlu1 %v450_v19 }
  0xf8   : > { %457 = vadd.xlane.f32.xlu0 %v449_v20 }
  0xfb   : > { %463 = vadd.xlane.f32.xlu1 %v452_v21 }
  0xfc   : > { %461 = vadd.xlane.f32.xlu0 %v451_v22 }
  0xff   : > { %467 = vadd.xlane.f32.xlu1 %v454_v23 }
 0x100   : > { %465 = vadd.xlane.f32.xlu0 %v453_v24 }
 0x103   : > { %471 = vadd.xlane.f32.xlu1 %v456_v25 }
 0x104   : > { %469 = vadd.xlane.f32.xlu0 %v455_v26 }
 0x174   : > { %v413_v29 = vpop.xlane.xlu1 %412 }
 0x175   : > { %v409_v30 = vpop.xlane.xlu0 %408  ;;  %v426_v31 = vadd.f32 %v413_v29, %v402_v27 }
 0x176   : > { %v424_v32 = vadd.f32 %v409_v30, %v400_v28 }
 0x177   : > { %435 = vst.msk [vmem:[#allocation2 + $0x10] sm:$0xff] %vm383_vm1, %v426_v31 }
 0x178   : > { %433 = vst.msk [vmem:[#allocation2] sm:$0xff] %vm383_vm1, %v424_v32  ;;  %v415_v35 = vpop.xlane.xlu1 %414 }
 0x179   : > { %v411_v36 = vpop.xlane.xlu0 %410  ;;  %v427_v37 = vadd.f32 %v415_v35, %v403_v33 }
 0x17a   : > { %v425_v38 = vadd.f32 %v411_v36, %v401_v34 }
 0x17b   : > { %436 = vst.msk [vmem:[#allocation2 + $0x18] sm:$0xff] %vm383_vm1, %v427_v37 }
 0x17c   : > { %434 = vst.msk [vmem:[#allocation2 + $0x8] sm:$0xff] %vm383_vm1, %v425_v38  ;;  %v419_v41 = vpop.xlane.xlu1 %418 }
 0x17d   : > { %v417_v42 = vpop.xlane.xlu0 %416  ;;  %v429_v43 = vadd.f32 %v419_v41, %v405_v39 }
 0x17e   : > { %v428_v44 = vadd.f32 %v417_v42, %v404_v40 }
 0x17f   : > { %438 = vst.msk [vmem:[#allocation2 + $0x28] sm:$0xff] %vm383_vm1, %v429_v43 }
 0x180   : > { %437 = vst.msk [vmem:[#allocation2 + $0x20] sm:$0xff] %vm383_vm1, %v428_v44  ;;  %v423_v47 = vpop.xlane.xlu1 %422 }
 0x181   : > { %v421_v48 = vpop.xlane.xlu0 %420  ;;  %v431_v49 = vadd.f32 %v423_v47, %v407_v45 }
 0x182   : > { %v430_v50 = vadd.f32 %v421_v48, %v406_v46 }
 0x183   : > { %440 = vst.msk [vmem:[#allocation2 + $0x38] sm:$0xff] %vm383_vm1, %v431_v49 }
 0x184   : > { %439 = vst.msk [vmem:[#allocation2 + $0x30] sm:$0xff] %vm383_vm1, %v430_v50  ;;  %v460_v53 = vpop.xlane.xlu1 %459 }
 0x185   : > { %v458_v54 = vpop.xlane.xlu0 %457  ;;  %v474_v55 = vadd.f32 %v460_v53, %v442_v51 }
 0x186   : > { %v473_v56 = vadd.f32 %v458_v54, %v441_v52 }
 0x187   : > { %482 = vst.msk [vmem:[#allocation3 + $0x8] sm:$0xff] %vm383_vm1, %v474_v55 }
 0x188   : > { %481 = vst.msk [vmem:[#allocation3] sm:$0xff] %vm383_vm1, %v473_v56  ;;  %v464_v59 = vpop.xlane.xlu1 %463 }
 0x189   : > { %v462_v60 = vpop.xlane.xlu0 %461  ;;  %v476_v61 = vadd.f32 %v464_v59, %v444_v57 }
 0x18a   : > { %v475_v62 = vadd.f32 %v462_v60, %v443_v58 }
 0x18b   : > { %484 = vst.msk [vmem:[#allocation3 + $0x18] sm:$0xff] %vm383_vm1, %v476_v61 }
 0x18c   : > { %483 = vst.msk [vmem:[#allocation3 + $0x10] sm:$0xff] %vm383_vm1, %v475_v62  ;;  %v468_v1 = vpop.xlane.xlu1 %467 }
 0x18d   : > { %v466_v2 = vpop.xlane.xlu0 %465  ;;  %v478_v3 = vadd.f32 %v468_v1, %v446_v63 }
 0x18e   : > { %v477_v4 = vadd.f32 %v466_v2, %v445_v0 }
 0x18f   : > { %486 = vst.msk [vmem:[#allocation3 + $0x28] sm:$0xff] %vm383_vm1, %v478_v3 }
 0x190   : > { %485 = vst.msk [vmem:[#allocation3 + $0x20] sm:$0xff] %vm383_vm1, %v477_v4  ;;  %v472_v7 = vpop.xlane.xlu1 %471 }
 0x191   : > { %v470_v8 = vpop.xlane.xlu0 %469  ;;  %v480_v9 = vadd.f32 %v472_v7, %v448_v5 }
 0x192   : > { %v479_v18 = vadd.f32 %v470_v8, %v447_v6 }
 0x193   : > { %488 = vst.msk [vmem:[#allocation3 + $0x38] sm:$0xff] %vm383_vm1, %v480_v9 }
 0x194   : > { %487 = vst.msk [vmem:[#allocation3 + $0x30] sm:$0xff] %vm383_vm1, %v479_v18 }
 0x195 PF: > { %p949_p5 = scmp.ne.s32.totalorder %s1106_s21, 1 }
 0x196   : > { %v500_v19 = vld [vmem:[#allocation2 + $0x18] sm:$0xff] (!%p949_p5)  ;;  %v1117_v21 = vmov (!%p949_p5), 0   ;;  %v497_v24 = vld [vmem:[#allocation2] sm:$0xff] (!%p949_p5)  ;;  %v502_v28 = vld [vmem:[#allocation2 + $0x28] sm:$0xff] (!%p949_p5)  ;;  %vm585_vm2 = vcmask (!%p949_p5), 7168   ;;  %vm788_vm3 = vcmask (!%p949_p5), 523264  }
 0x197   : > { %492 = sbr.rel (%p949_p5) target bundleno = 823 (0x337), region = 56  ;;  %v516_v20 = vld [vmem:[#allocation3 + $0x18] sm:$0xff] (!%p949_p5)  ;;  %1043 = vset.pattern.permute.xlu1 (!%p949_p5), %v1117_v21  ;;  %1042 = vset.pattern.permute.xlu0 (!%p949_p5), %v1117_v21  ;;  %v1276_v22 = vmul.f32 (!%p949_p5), 0.0625, %v500_v19  ;;  %v513_v25 = vld [vmem:[#allocation3] sm:$0xff] (!%p949_p5)  ;;  %v1278_v26 = vmul.f32 (!%p949_p5), 0.0625, %v497_v24  ;;  %v518_v29 = vld [vmem:[#allocation3 + $0x28] sm:$0xff] (!%p949_p5) }
 0x198   : > { %v524_v23 = vmul.f32 (!%p949_p5), 0.0625, %v516_v20  ;;  %v521_v27 = vmul.f32 (!%p949_p5), 0.0625, %v513_v25  ;;  %v1282_v31 = vmul.f32 (!%p949_p5), 0.0625, %v502_v28  ;;  %v526_v32 = vmul.f32 (!%p949_p5), 0.0625, %v518_v29  ;;  %v498_v33 = vld [vmem:[#allocation2 + $0x8] sm:$0xff] (!%p949_p5)  ;;  %v504_v38 = vld [vmem:[#allocation2 + $0x38] sm:$0xff] (!%p949_p5) }
 0x199   : > { %v532_v30 = vmul.f32 (!%p949_p5), %v1276_v22, %v1276_v22  ;;  %v514_v34 = vld [vmem:[#allocation3 + $0x8] sm:$0xff] (!%p949_p5)  ;;  %v529_v35 = vmul.f32 (!%p949_p5), %v1278_v26, %v1278_v26  ;;  %v1286_v36 = vmul.f32 (!%p949_p5), 0.0625, %v498_v33  ;;  %v1290_v42 = vmul.f32 (!%p949_p5), 0.0625, %v504_v38  ;;  %v499_v44 = vld [vmem:[#allocation2 + $0x10] sm:$0xff] (!%p949_p5)  ;;  %v501_v50 = vld [vmem:[#allocation2 + $0x20] sm:$0xff] (!%p949_p5) }
 0x19a   : > { %v522_v37 = vmul.f32 (!%p949_p5), 0.0625, %v514_v34  ;;  %v520_v39 = vld [vmem:[#allocation3 + $0x38] sm:$0xff] (!%p949_p5)  ;;  %v534_v41 = vmul.f32 (!%p949_p5), %v1282_v31, %v1282_v31  ;;  %v515_v45 = vld [vmem:[#allocation3 + $0x10] sm:$0xff] (!%p949_p5)  ;;  %v1294_v48 = vmul.f32 (!%p949_p5), 0.0625, %v499_v44  ;;  %v517_v51 = vld [vmem:[#allocation3 + $0x20] sm:$0xff] (!%p949_p5)  ;;  %v1298_v55 = vmul.f32 (!%p949_p5), 0.0625, %v501_v50 }
 0x19b   : > { %v540_v40 = vsub.f32 (!%p949_p5), %v524_v23, %v532_v30  ;;  %v528_v43 = vmul.f32 (!%p949_p5), 0.0625, %v520_v39  ;;  %v537_v46 = vsub.f32 (!%p949_p5), %v521_v27, %v529_v35  ;;  %v530_v47 = vmul.f32 (!%p949_p5), %v1286_v36, %v1286_v36  ;;  %v503_v56 = vld [vmem:[#allocation2 + $0x30] sm:$0xff] (!%p949_p5)  ;;  %v556_v29 = vld [vmem:[%s1446_s2 + $0x18] sm:$0xff] (!%p949_p5)  ;;  %v558_v34 = vld [vmem:[%s1446_s2 + $0x28] sm:$0xff] (!%p949_p5) }
 0x19c   : > { %v523_v49 = vmul.f32 (!%p949_p5), 0.0625, %v515_v45  ;;  %v542_v53 = vsub.f32 (!%p949_p5), %v526_v32, %v534_v41  ;;  %v536_v54 = vmul.f32 (!%p949_p5), %v1290_v42, %v1290_v42  ;;  %v531_v59 = vmul.f32 (!%p949_p5), %v1294_v48, %v1294_v48  ;;  %v519_v1 = vld [vmem:[#allocation3 + $0x30] sm:$0xff] (!%p949_p5)  ;;  %v553_v32 = vld [vmem:[%s1446_s2] sm:$0xff] (!%p949_p5)  ;;  %v554_v38 = vld [vmem:[%s1446_s2 + $0x8] sm:$0xff] (!%p949_p5) }
 0x19d   : > { %v548_v52 = vmax.f32 (!%p949_p5), %v540_v40, 0.0  ;;  %v545_v57 = vmax.f32 (!%p949_p5), %v537_v46, 0.0  ;;  %v538_v58 = vsub.f32 (!%p949_p5), %v522_v37, %v530_v47  ;;  %v525_v60 = vmul.f32 (!%p949_p5), 0.0625, %v517_v51  ;;  %v560_v41 = vld [vmem:[%s1446_s2 + $0x38] sm:$0xff] (!%p949_p5)  ;;  %v555_v47 = vld [vmem:[%s1446_s2 + $0x10] sm:$0xff] (!%p949_p5) }
 0x19e   : > { %v550_v62 = vmax.f32 %v542_v53, 0.0  ;;  %v544_v63 = vsub.f32 %v528_v43, %v536_v54  ;;  %v533_v0 = vmul.f32 %v1298_v55, %v1298_v55  ;;  %v539_v4 = vsub.f32 %v523_v49, %v531_v59  ;;  %v597_v43 = vld [vmem:[%s1447_s3 + $0x18] sm:$0xff]  ;;  %v594_v49 = vld [vmem:[%s1447_s3] sm:$0xff] }
 0x19f   : > { %v564_v61 = vadd.f32 1e-05, %v548_v52  ;;  %v561_v2 = vadd.f32 1e-05, %v545_v57  ;;  %v546_v3 = vmax.f32 %v538_v58, 0.0  ;;  %v1304_v5 = vmul.f32 0.0625, %v503_v56 }
 0x1a0   : > { %v566_v6 = vadd.f32 1e-05, %v550_v62  ;;  %v552_v7 = vmax.f32 %v544_v63, 0.0  ;;  %v541_v8 = vsub.f32 %v525_v60, %v533_v0  ;;  %v547_v18 = vmax.f32 %v539_v4, 0.0  ;;  %v557_v53 = vld [vmem:[%s1446_s2 + $0x20] sm:$0xff]  ;;  %v595_v57 = vld [vmem:[%s1447_s3 + $0x8] sm:$0xff] }
 0x1a1   : > { %1046 = vrsqrt.f32 %v564_v61  ;;  %v562_v9 = vadd.f32 1e-05, %v546_v3  ;;  %v527_v19 = vmul.f32 0.0625, %v519_v1  ;;  %v535_v23 = vmul.f32 %v1304_v5, %v1304_v5  ;;  %v601_v63 = vld [vmem:[%s1447_s3 + $0x38] sm:$0xff]  ;;  %v559_v3 = vld [vmem:[%s1446_s2 + $0x30] sm:$0xff] }
 0x1a2   : > { %1048 = vrsqrt.f32 %v561_v2  ;;  %v568_v20 = vadd.f32 1e-05, %v552_v7  ;;  %v549_v21 = vmax.f32 %v541_v8, 0.0  ;;  %v563_v24 = vadd.f32 1e-05, %v547_v18 }
 0x1a3   : > { %1050 = vrsqrt.f32 %v566_v6  ;;  %v543_v27 = vsub.f32 %v527_v19, %v535_v23  ;;  %v598_v6 = vld [vmem:[%s1447_s3 + $0x20] sm:$0xff] }
 0x1a4   : > { %1052 = vrsqrt.f32 %v562_v9  ;;  %v565_v25 = vadd.f32 1e-05, %v549_v21 }
 0x1a5   : > { %1054 = vrsqrt.f32 %v568_v20  ;;  %v551_v28 = vmax.f32 %v543_v27, 0.0 }
 0x1a6   : > { %1056 = vrsqrt.f32 %v563_v24 }
 0x1a7   : > { %1058 = vrsqrt.f32 %v565_v25  ;;  %v567_v30 = vadd.f32 1e-05, %v551_v28 }
 0x1a9   : > { %1060 = vrsqrt.f32 %v567_v30 }
 0x1ab   : > { %v1047_v33 = vpop.eup %1046 }
 0x1ac   : > { %v1049_v35 = vpop.eup %1048  ;;  %v580_v37 = vmul.f32 %v1047_v33, %v556_v29 }
 0x1ad   : > { %v1051_v39 = vpop.eup %1050  ;;  %v577_v40 = vmul.f32 %v1049_v35, %v553_v32 }
 0x1ae   : > { %v1053_v44 = vpop.eup %1052  ;;  %589 = vst.msk [vmem:[#allocation4 + $0x18] sm:$0xff] %vm585_vm2, %v580_v37  ;;  %v605_v45 = vmul.f32 %v580_v37, %v1276_v22  ;;  %v582_v46 = vmul.f32 %v1051_v39, %v558_v34  ;;  %v599_v22 = vld [vmem:[%s1447_s3 + $0x28] sm:$0xff] }
 0x1af   : > { %v1055_v50 = vpop.eup %1054  ;;  %586 = vst.msk [vmem:[#allocation4] sm:$0xff] %vm585_vm2, %v577_v40  ;;  %v602_v51 = vmul.f32 %v577_v40, %v1278_v26  ;;  %v578_v52 = vmul.f32 %v1053_v44, %v554_v38  ;;  %v755_v40 = vld [vmem:[%s1449_s5 + $0x8] sm:$0xff]  ;;  %v756_v44 = vld [vmem:[%s1449_s5 + $0x10] sm:$0xff] }
 0x1b0   : > { %v1057_v54 = vpop.eup %1056  ;;  %591 = vst.msk [vmem:[#allocation4 + $0x28] sm:$0xff] %vm585_vm2, %v582_v46  ;;  %v584_v56 = vmul.f32 %v1055_v50, %v560_v41  ;;  %v613_v58 = vsub.f32 %v597_v43, %v605_v45  ;;  %v607_v26 = vmul.f32 %v582_v46, %v1282_v31  ;;  %v596_v31 = vld [vmem:[%s1447_s3 + $0x10] sm:$0xff]  ;;  %v754_v41 = vld [vmem:[%s1449_s5] sm:$0xff]  ;;  %v757_v43 = vld [vmem:[%s1449_s5 + $0x18] sm:$0xff] }
 0x1b1   : > { %v1059_v59 = vpop.eup %1058  ;;  %587 = vst.msk [vmem:[#allocation4 + $0x8] sm:$0xff] %vm585_vm2, %v578_v52  ;;  %v579_v60 = vmul.f32 %v1057_v54, %v555_v47  ;;  %v610_v61 = vsub.f32 %v594_v49, %v602_v51  ;;  %v603_v62 = vmul.f32 %v578_v52, %v1286_v36  ;;  %v1044_v45 = vld [vmem:[%s1448_s4] sm:$0xff]  }
 0x1b2   : > { %593 = vst.msk [vmem:[#allocation4 + $0x38] sm:$0xff] %vm585_vm2, %v584_v56  ;;  %v581_v0 = vmul.f32 %v1059_v59, %v557_v53  ;;  %621 = vst.msk [vmem:[#allocation5 + $0x18] sm:$0xff] %vm585_vm2, %v613_v58  ;;  %v615_v1 = vsub.f32 %v599_v22, %v607_v26  ;;  %v609_v2 = vmul.f32 %v584_v56, %v1290_v42  ;;  %990 = vmatprep.mubr.msk.bf16.mxu0 %vm788_vm3, %v1044_v45 }
 0x1b3   : > { %588 = vst.msk [vmem:[#allocation4 + $0x10] sm:$0xff] %vm585_vm2, %v579_v60  ;;  %618 = vst.msk [vmem:[#allocation5] sm:$0xff] %vm585_vm2, %v610_v61  ;;  %v611_v36 = vsub.f32 %v595_v57, %v603_v62  ;;  %v604_v4 = vmul.f32 %v579_v60, %v1294_v48  ;;  %v1061_v8 = vpop.eup %1060 }
 0x1b4   : > { %590 = vst.msk [vmem:[#allocation4 + $0x20] sm:$0xff] %vm585_vm2, %v581_v0  ;;  %623 = vst.msk [vmem:[#allocation5 + $0x28] sm:$0xff] %vm585_vm2, %v615_v1  ;;  %v606_v42 = vmul.f32 %v581_v0, %v1298_v55  ;;  %v617_v7 = vsub.f32 %v601_v63, %v609_v2  ;;  %v583_v20 = vmul.f32 %v1061_v8, %v559_v3  ;;  %v600_v55 = vld [vmem:[%s1447_s3 + $0x30] sm:$0xff] }
 0x1b5   : > { %v629_v9 = vld [vmem:[#allocation4 + $0x18] sm:$0xff]  ;;  %619 = vst.msk [vmem:[#allocation5 + $0x8] sm:$0xff] %vm585_vm2, %v611_v36  ;;  %v612_v18 = vsub.f32 %v596_v31, %v604_v4 }
 0x1b6   : > { %651 = vperm.xlu1 %1043, %v629_v9   ;;  %v626_v19 = vld [vmem:[#allocation4] sm:$0xff]  ;;  %v614_v48 = vsub.f32 %v598_v6, %v606_v42  ;;  %625 = vst.msk [vmem:[#allocation5 + $0x38] sm:$0xff] %vm585_vm2, %v617_v7  ;;  %592 = vst.msk [vmem:[#allocation4 + $0x30] sm:$0xff] %vm585_vm2, %v583_v20  ;;  %v608_v24 = vmul.f32 %v583_v20, %v1304_v5 }
 0x1b7   : > { %636 = vperm.xlu0 %1042, %v626_v19   ;;  %v631_v21 = vld [vmem:[#allocation4 + $0x28] sm:$0xff]  ;;  %620 = vst.msk [vmem:[#allocation5 + $0x10] sm:$0xff] %vm585_vm2, %v612_v18 }
 0x1b8   : > { %v627_v23 = vld [vmem:[#allocation4 + $0x8] sm:$0xff]  ;;  %622 = vst.msk [vmem:[#allocation5 + $0x20] sm:$0xff] %vm585_vm2, %v614_v48  ;;  %v616_v25 = vsub.f32 %v600_v55, %v608_v24 }
 0x1b9   : > { %v633_v27 = vld [vmem:[#allocation4 + $0x38] sm:$0xff] }
 0x1ba   : > { %661 = vperm.xlu1 %1043, %v631_v21   ;;  %v628_v28 = vld [vmem:[#allocation4 + $0x10] sm:$0xff]  ;;  %624 = vst.msk [vmem:[#allocation5 + $0x30] sm:$0xff] %vm585_vm2, %v616_v25  ;;  %v682_v29 = vld [vmem:[#allocation5] sm:$0xff]  ;;  %v685_v34 = vld [vmem:[#allocation5 + $0x18] sm:$0xff] }
 0x1bb   : > { %641 = vperm.xlu0 %1042, %v627_v23   ;;  %v630_v30 = vld [vmem:[#allocation4 + $0x20] sm:$0xff]  ;;  %v687_v5 = vld [vmem:[#allocation5 + $0x28] sm:$0xff] }
 0x1bc   : > { %v683_v32 = vld [vmem:[#allocation5 + $0x8] sm:$0xff] }
 0x1bd   : > { %v632_v33 = vld [vmem:[#allocation4 + $0x30] sm:$0xff]  ;;  %v689_v38 = vld [vmem:[#allocation5 + $0x38] sm:$0xff] }
 0x1be   : > { %671 = vperm.xlu1 %1043, %v633_v27   ;;  %v684_v35 = vld [vmem:[#allocation5 + $0x10] sm:$0xff] }
 0x1bf   : > { %646 = vperm.xlu0 %1042, %v628_v28   ;;  %v686_v37 = vld [vmem:[#allocation5 + $0x20] sm:$0xff] }
 0x1c1   : > { %v688_v39 = vld [vmem:[#allocation5 + $0x30] sm:$0xff] }
 0x1c2   : > { %692 = vperm.xlu1 %1043, %v682_v29  }
 0x1c3   : > { %656 = vperm.xlu0 %1042, %v630_v30  }
 0x1c6   : > { %697 = vperm.xlu1 %1043, %v683_v32  }
 0x1c7   : > { %666 = vperm.xlu0 %1042, %v632_v33  }
 0x1ca   : > { %707 = vperm.xlu1 %1043, %v685_v34  }
 0x1cb   : > { %702 = vperm.xlu0 %1042, %v684_v35  }
 0x1ce   : > { %717 = vperm.xlu1 %1043, %v687_v5  }
 0x1cf   : > { %712 = vperm.xlu0 %1042, %v686_v37  }
 0x1d2   : > { %727 = vperm.xlu1 %1043, %v689_v38  }
 0x1d3   : > { %722 = vperm.xlu0 %1042, %v688_v39  }
 0x1d6   : > { %765 = vperm.xlu1 %1043, %v755_v40  }
 0x1d7   : > { %760 = vperm.xlu0 %1042, %v754_v41  }
 0x1da   : > { %775 = vperm.xlu1 %1043, %v757_v43  }
 0x1db   : > { %770 = vperm.xlu0 %1042, %v756_v44  }
 0x235   : > { %v652_v46 = vpop.permute.xlu1 %651 }
 0x236   : > { %v637_v47 = vpop.permute.xlu0 %636  ;;  %v677_v60 = vmul.f32 %v1210_v14, %v652_v46 }
 0x237   : > { %v674_v22 = vmul.f32 %v637_v47, %v1206_v12 }
 0x239   : > { %v662_v49 = vpop.permute.xlu1 %661 }
 0x23a   : > { %v642_v50 = vpop.permute.xlu0 %641  ;;  %v679_v12 = vmul.f32 %v662_v49, %v1216_v17 }
 0x23b   : > { %v675_v56 = vmul.f32 %v642_v50, %v1214_v16 }
 0x23d   : > { %v672_v51 = vpop.permute.xlu1 %671 }
 0x23e   : > { %v647_v52 = vpop.permute.xlu0 %646 }
 0x23f   : > { %v676_v63 = vmul.f32 %v1202_v10, %v647_v52  ;;  %v681_v10 = vmul.f32 %v1212_v15, %v672_v51  ;;  %v1045_v15 = vld [vmem:[%s1448_s4 + $0x8] sm:$0xff]  }
 0x241   : > { %v693_v53 = vpop.permute.xlu1 %692 }
 0x242   : > { %v657_v54 = vpop.permute.xlu0 %656  ;;  %v730_v57 = vadd.f32 %v693_v53, %v674_v22 }
 0x243   : > { %v678_v16 = vmul.f32 %v657_v54, %v1208_v13 }
 0x244   : > { %v738_v61 = vmax.f32 %v730_v57, 0.0 }
 0x245   : > { %v698_v58 = vpop.permute.xlu1 %697 }
 0x246   : > { %v731_v26 = vadd.f32 %v698_v58, %v675_v56  ;;  %v667_v59 = vpop.permute.xlu0 %666 }
 0x247   : > { %v680_v18 = vmul.f32 %v1204_v11, %v667_v59 }
 0x248   : > { %v739_v62 = vmax.f32 %v731_v26, 0.0 }
 0x249   : > { %v708_v0 = vpop.permute.xlu1 %707 }
 0x24a   : > { %v733_v31 = vadd.f32 %v708_v0, %v677_v60  ;;  %v703_v1 = vpop.permute.xlu0 %702  ;;  %v750_v2 = vpack.c.bf16 %v739_v62, %v738_v61 }
 0x24b   : > { %v732_v36 = vadd.f32 %v703_v1, %v676_v63 }
 0x24c   : > { %v741_v3 = vmax.f32 %v733_v31, 0.0  ;;  %982 = vmatprep.subr.bf16.mxu0 %v750_v2 }
 0x24d   : > { %v740_v4 = vmax.f32 %v732_v36, 0.0  ;;  %v718_v6 = vpop.permute.xlu1 %717  ;;  %983 = vmatpush3.bf16.msra.mxu0 %v750_v2 }
 0x24e   : > { %v735_v42 = vadd.f32 %v718_v6, %v679_v12  ;;  %v713_v14 = vpop.permute.xlu0 %712 }
 0x24f   : > { %v751_v7 = vpack.c.bf16 %v741_v3, %v740_v4  ;;  %v734_v8 = vadd.f32 %v713_v14, %v678_v16 }
 0x250   : > { %v743_v9 = vmax.f32 %v735_v42, 0.0 }
 0x251   : > { %v742_v19 = vmax.f32 %v734_v8, 0.0  ;;  %984 = vmatprep.subr.bf16.mxu0 %v751_v7  ;;  %v728_v20 = vpop.permute.xlu1 %727 }
 0x252   : > { %v737_v17 = vadd.f32 %v728_v20, %v681_v10  ;;  %985 = vmatpush3.bf16.msra.mxu0 %v751_v7  ;;  %v723_v48 = vpop.permute.xlu0 %722 }
 0x253   : > { %v752_v21 = vpack.c.bf16 %v743_v9, %v742_v19  ;;  %v736_v13 = vadd.f32 %v723_v48, %v680_v18 }
 0x254   : > { %v745_v55 = vmax.f32 %v737_v17, 0.0 }
 0x255   : > { %v744_v23 = vmax.f32 %v736_v13, 0.0  ;;  %986 = vmatprep.subr.bf16.mxu0 %v752_v21  ;;  %v766_v25 = vpop.permute.xlu1 %765 }
 0x256   : > { %987 = vmatpush3.bf16.msra.mxu0 %v752_v21  ;;  %v761_v11 = vpop.permute.xlu0 %760 }
 0x257   : > { %v753_v24 = vpack.c.bf16 %v745_v55, %v744_v23 }
 0x259   : > { %988 = vmatprep.subr.bf16.mxu0 %v753_v24  ;;  %v776_v32 = vpop.permute.xlu1 %775 }
 0x25a   : > { %989 = vmatpush3.bf16.msra.mxu0 %v753_v24  ;;  %v771_v27 = vpop.permute.xlu0 %770 }
 0x25d   : > { %991 = vmatmul.mubr.msk.bf16.vlgmr.msra.gmra.mrb[0].mxu0 %vm788_vm3, %v1045_v15 }
 0x330   : > { %v992_v28 = vpop.f32.mrb[0].mxu0 }
 0x331   : > { %v838_v29 = vadd.f32 %v992_v28, %v771_v27  ;;  %v829_v30 = vpop.f32.mrb[1].mxu0 }
 0x332   : > { %v830_v33 = vadd.f32 %v829_v30, %v761_v11  ;;  %v993_v34 = vpop.f32.mrb[2].mxu0 }
 0x333   : > { %846 = vst [vmem:[#allocation6 + $0x10] sm:$0xff] %v838_v29  ;;  %v841_v35 = vadd.f32 %v993_v34, %v776_v32  ;;  %v832_v5 = vpop.f32.mrb[3].mxu0 }
 0x334   : > { %844 = vst [vmem:[#allocation6] sm:$0xff] %v830_v33  ;;  %v833_v37 = vadd.f32 %v832_v5, %v766_v25 }
 0x335   : > { %847 = vst [vmem:[#allocation6 + $0x18] sm:$0xff] %v841_v35 }
 0x336   : > { %845 = vst [vmem:[#allocation6 + $0x8] sm:$0xff] %v833_v37 }
 0x337 PF: > { %p1410_p6 = scmp.eq.s32.totalorder %s935_s24, 1  ;;  %s1118_s7 = smov [#allocation6]  }
 0x338   : > { %s862_s8 = sshll.u32 %s1118_s7, 4  ;;  %s863_s8 = int_to_ptr.vmem [resolvable:$true] %s862_s8 }
 0x339   : > { %s1062_s9 = scalar_lea.vmem %s863_s8, 512  ;;  %s1068_s10 = scalar_lea.vmem %s863_s8, 1024 }
 0x33a   : > { %p1063_p7 = scmp.ne.s32.totalorder %s863_s8, %s1062_s9  ;;  %p1069_p10 = scmp.lt.s32.totalorder %s863_s8, %s863_s8 }
 0x33b   : > { %p1070_p11 = scmp.lt.s32.totalorder %s1068_s10, %s1062_s9 }
 0x33c   : > { %p1064_p8 = pnand %p1063_p7, %p1410_p6 }
 0x33d   : > { %p1071_p12 = por %p1070_p11, %p1069_p10 }
 0x33e   : > { %p1065_p9 = pneg %p1064_p8 }
 0x340   : > { %p1072_p13 = pnand %p1071_p12, %p1065_p9 }
 0x342   : > { %1075 = shalt.err (!%p1072_p13)
}
 0x343   : > { %s1076_s12 = scalar_lea.hbm %s1450_s6, 512 }
 0x344   : > { %p1077_p0 = scmp.ne.s32.totalorder %s1450_s6, %s1076_s12  ;;  %p1082_p3 = scmp.lt.u32.totalorder %s1076_s12, %s1450_s6 }
 0x346   : > { %p1078_p1 = pnand %p1077_p0, %p1410_p6 }
 0x348   : > { %p1079_p2 = pneg %p1078_p1 }
 0x34a   : > { %p1084_p4 = pnand %p1082_p3, %p1079_p2 }
 0x34c   : > { %1087 = shalt.err (!%p1084_p4)
}
 0x34d   : > { %s1119_s17 = smov 128   ;;  %s1120_s18 = smov 8  }
 0x34e   : > { %999 = dma.vmem_to_hbm [thread:$0]  (%p1410_p6), %s863_s8, 512, %s1450_s6, [#allocation7], %s1119_s17, %s1119_s17, %s1120_s18  }
 0x34f PF: > { %p1007_p5 = scmp.ge.s32.totalorder %s1114_s23, 2  ;;  %p1008_p7 = scmp.eq.s32.totalorder %s936_s25, 1 }
 0x351   : > { %p1003_p8 = pnand %p1008_p7, %p1007_p5 }
 0x353   : > { %1101 = dma.done.wait (!%p1003_p8), [#allocation7], 512  }
 0x354   : > { %1103 = vsyncadd (!%p1003_p8), [#allocation7], 4294966784  ;;  %s19_s23 = sadd.s32 1, %s1114_s23   ;;  %s1452_s21 = smov %s1110_s22 }
 0x355   : > { %p16_p9 = scmp.ge.s32.totalorder %s19_s23, 4   ;;  %s1453_s22 = smov %s1455_s26 }
 0x357   :  { %18 = sbr.rel (!%p16_p9) target bundleno = 3 (0x3), region = 95 }
 0x35e   :  { %883 = vsyncpa [#allocation7], 1 }
 0x35f   :  { %885 = vsyncpa [#allocation7 + $0x1], 1 }

</bundles_post_ra>
